<compile_context>
chip_gen: v7x
topology: tpu7x:2x2x1
jax: 0.10.0
libtpu: 0.0.40
codegen_flags: <defaults>
</compile_context>

<pallas_src>
import jax
import jax.numpy as jnp
from jax import lax
from jax.experimental import pallas as pl
from jax.experimental.pallas import tpu as pltpu


def _round_up(a, b):
    return -(-a // b) * b


def make_final_patch_expand_kernel(eps, matmul_dtype):
    """Fused matmul + grouped-LayerNorm kernel body (lane-dense layout)."""

    def kernel(x_ref, w_ref, avg_ref, gamma_ref, beta_ref, o_ref):
        # x_ref:     (tm, dim)
        # w_ref:     (P*dim, dim)        -- native nn.Linear weight layout
        # avg_ref:   (P*dim, P*dim)      -- block-diagonal 1/dim averaging matrix
        # gamma_ref: (1, P*dim)          -- LayerNorm gamma tiled P times
        # beta_ref:  (1, P*dim)          -- LayerNorm beta tiled P times
        # o_ref:     (tm, P*dim)
        x_blk = x_ref[...]
        w_blk = w_ref[...]
        if matmul_dtype is not None:
            x_blk = x_blk.astype(matmul_dtype)
            w_blk = w_blk.astype(matmul_dtype)

        # y[i, p*dim + c] = sum_k x[i, k] * W[p*dim + c, k]   (== x @ W.T), f32 acc.
        y = lax.dot_general(
            x_blk, w_blk,
            dimension_numbers=(((1,), (1,)), ((), ())),
            preferred_element_type=jnp.float32)              # (tm, P*dim)

        # Per-(row, dim-group) stats, computed without leaving the lane-dense
        # (tm, P*dim) layout: y @ A gives the group mean broadcast over the group,
        # (y*y) @ A gives E[y^2] broadcast the same way. Single-pass variance.
        a = avg_ref[...]
        mean = lax.dot_general(y, a, (((1,), (0,)), ((), ())),
                               preferred_element_type=jnp.float32)
        ex2 = lax.dot_general(y * y, a, (((1,), (0,)), ((), ())),
                              preferred_element_type=jnp.float32)
        var = jnp.maximum(ex2 - mean * mean, 0.0)

        y_hat = (y - mean) * lax.rsqrt(var + eps)
        out = y_hat * gamma_ref[...] + beta_ref[...]
        o_ref[...] = out.astype(o_ref.dtype)

    return kernel


def final_patch_expand_x4(x, w, gamma, beta, *, patch_size, tm=256, eps=1e-5,
                          matmul_dtype=None):
    """
    x:     (B, N, dim)
    w:     (patch_size*dim, dim)   -- PyTorch nn.Linear weight layout
    gamma: (dim,)                  -- LayerNorm weight
    beta:  (dim,)                  -- LayerNorm bias
    returns (B, N*patch_size, dim)
    """
    B, N, dim = x.shape
    P = patch_size
    M = B * N
    out_cols = P * dim

    # Row tile: as large as requested, multiple of 8 sublanes, no bigger than
    # the (rounded-up) problem size. Remainder rows are zero-padded (LN of a
    # zero row is finite: var=0, eps keeps rsqrt defined) and sliced off after.
    tm_eff = min(tm, _round_up(M, 8))
    tm_eff = max(8, _round_up(tm_eff, 8))
    m_pad = _round_up(M, tm_eff)

    x2 = x.reshape(M, dim)
    if m_pad != M:
        x2 = jnp.pad(x2, ((0, m_pad - M), (0, 0)))

    # Block-diagonal averaging matrix: A[k, j] = 1/dim if k, j in same dim-group.
    avg = jnp.kron(jnp.eye(P, dtype=jnp.float32),
                   jnp.full((dim, dim), 1.0 / dim, dtype=jnp.float32))

    gamma_t = jnp.tile(gamma.astype(jnp.float32), P).reshape(1, out_cols)
    beta_t = jnp.tile(beta.astype(jnp.float32), P).reshape(1, out_cols)

    kernel = make_final_patch_expand_kernel(eps, matmul_dtype)

    out = pl.pallas_call(
        kernel,
        out_shape=jax.ShapeDtypeStruct((m_pad, out_cols), x.dtype),
        grid_spec=pltpu.PrefetchScalarGridSpec(
            num_scalar_prefetch=0,
            grid=(m_pad // tm_eff,),
            in_specs=[
                pl.BlockSpec((tm_eff, dim), lambda i: (i, 0)),
                pl.BlockSpec((out_cols, dim), lambda i: (0, 0)),
                pl.BlockSpec((out_cols, out_cols), lambda i: (0, 0)),
                pl.BlockSpec((1, out_cols), lambda i: (0, 0)),
                pl.BlockSpec((1, out_cols), lambda i: (0, 0)),
            ],
            out_specs=pl.BlockSpec((tm_eff, out_cols), lambda i: (i, 0)),
        ),
        compiler_params=pltpu.CompilerParams(
            dimension_semantics=("parallel",),
            vmem_limit_bytes=48 * 1024 * 1024,
        ),
    )(x2, w, avg, gamma_t, beta_t)

    # Free row-major reshape: (M, P*dim) -> (B, N*P, dim) == 'b n (p c) -> b (n p) c'.
    return out[:M].reshape(B, N * P, dim)


def reference(x, w, gamma, beta, patch_size, eps=1e-5):
    """Pure-JAX reference matching the PyTorch module."""
    B, N, dim = x.shape
    y = jnp.einsum("bnd,od->bno", x, w)            # Linear, no bias
    y = y.reshape(B, N * patch_size, dim)          # 'b n (p c) -> b (n p) c'
    mean = jnp.mean(y, axis=-1, keepdims=True)
    var = jnp.mean((y - mean) ** 2, axis=-1, keepdims=True)
    y_hat = (y - mean) / jnp.sqrt(var + eps)
    return y_hat * gamma + beta


if __name__ == "__main__":
    # Small shapes consistent with the module's forward: x is (B, N, dim).
    B, N, dim, patch_size = 2, 12, 32, 4

    key = jax.random.PRNGKey(0)
    kx, kw, kg, kb = jax.random.split(key, 4)

    x = jax.random.normal(kx, (B, N, dim), dtype=jnp.float32)
    # nn.Linear(dim, patch_size*dim, bias=False).weight has shape (P*dim, dim)
    w = jax.random.normal(kw, (patch_size * dim, dim), dtype=jnp.float32) * 0.05
    gamma = 1.0 + 0.1 * jax.random.normal(kg, (dim,), dtype=jnp.float32)
    beta = 0.1 * jax.random.normal(kb, (dim,), dtype=jnp.float32)

    ref = reference(x, w, gamma, beta, patch_size)

    # Default (single large tile covers all rows).
    out = final_patch_expand_x4(x, w, gamma, beta, patch_size=patch_size)
    out = jax.block_until_ready(out)
    assert out.shape == (B, N * patch_size, dim)
    assert jnp.allclose(out, ref, atol=1e-4, rtol=1e-4), (
        float(jnp.max(jnp.abs(out - ref))))

    # Small tile to exercise the multi-step grid and the padded remainder path
    # (M = 24 rows, tm = 16 -> 2 grid steps with 8 padded rows).
    out2 = final_patch_expand_x4(x, w, gamma, beta, patch_size=patch_size, tm=16)
    out2 = jax.block_until_ready(out2)
    assert jnp.allclose(out2, ref, atol=1e-4, rtol=1e-4), (
        float(jnp.max(jnp.abs(out2 - ref))))

    print("KERNEL_OK")
</pallas_src>

<mosaic_0001>
module attributes {stable_mosaic.version = 11 : i64} {
  func.func @kernel(%arg0: i32, %arg1: memref<24x32xf32, #tpu.memory_space<vmem>>, %arg2: memref<128x32xf32, #tpu.memory_space<vmem>>, %arg3: memref<128x128xf32, #tpu.memory_space<vmem>>, %arg4: memref<1x128xf32, #tpu.memory_space<vmem>>, %arg5: memref<1x128xf32, #tpu.memory_space<vmem>>, %arg6: memref<24x128xf32, #tpu.memory_space<vmem>>) attributes {dimension_semantics = [#tpu.dimension_semantics<parallel>], iteration_bounds = array<i64: 1>, scalar_prefetch = 0 : i64, scratch_operands = 0 : i64, tpu.core_type = #tpu.core_type<tc>, window_params = [{transform_indices = @transform_0, window_bounds = array<i64: 24, 32>}, {pipeline_mode = #tpu.pipeline_mode<synchronous>, transform_indices = @transform_1, window_bounds = array<i64: 128, 32>}, {pipeline_mode = #tpu.pipeline_mode<synchronous>, transform_indices = @transform_2, window_bounds = array<i64: 128, 128>}, {pipeline_mode = #tpu.pipeline_mode<synchronous>, transform_indices = @transform_3, window_bounds = array<i64: 1, 128>}, {pipeline_mode = #tpu.pipeline_mode<synchronous>, transform_indices = @transform_4, window_bounds = array<i64: 1, 128>}, {transform_indices = @transform_5, window_bounds = array<i64: 24, 128>}]} {
    %c0 = arith.constant 0 : index
    %c0_0 = arith.constant 0 : index
    %0 = vector.load %arg1[%c0, %c0_0] : memref<24x32xf32, #tpu.memory_space<vmem>>, vector<24x32xf32>
    %c0_1 = arith.constant 0 : index
    %c0_2 = arith.constant 0 : index
    %1 = vector.load %arg2[%c0_1, %c0_2] : memref<128x32xf32, #tpu.memory_space<vmem>>, vector<128x32xf32>
    %cst = arith.constant dense<0.000000e+00> : vector<24x128xf32>
    %2 = tpu.matmul %0, %1, %cst {dimension_numbers = #tpu.dot_dimension_numbers<[1], [1], [0], [0], [0, 0, 1, 0], [], []>} : vector<24x32xf32>, vector<128x32xf32>, vector<24x128xf32> -> vector<24x128xf32>
    %c0_3 = arith.constant 0 : index
    %c0_4 = arith.constant 0 : index
    %3 = vector.load %arg3[%c0_3, %c0_4] : memref<128x128xf32, #tpu.memory_space<vmem>>, vector<128x128xf32>
    %cst_5 = arith.constant dense<0.000000e+00> : vector<24x128xf32>
    %4 = tpu.matmul %2, %3, %cst_5 {dimension_numbers = #tpu.dot_dimension_numbers<[1], [0], [0], [1], [0, 0, 1, 1], [], []>} : vector<24x128xf32>, vector<128x128xf32>, vector<24x128xf32> -> vector<24x128xf32>
    %5 = arith.mulf %2, %2 : vector<24x128xf32>
    %cst_6 = arith.constant dense<0.000000e+00> : vector<24x128xf32>
    %6 = tpu.matmul %5, %3, %cst_6 {dimension_numbers = #tpu.dot_dimension_numbers<[1], [0], [0], [1], [0, 0, 1, 1], [], []>} : vector<24x128xf32>, vector<128x128xf32>, vector<24x128xf32> -> vector<24x128xf32>
    %7 = arith.mulf %4, %4 : vector<24x128xf32>
    %8 = arith.subf %6, %7 : vector<24x128xf32>
    %cst_7 = arith.constant 0.000000e+00 : f32
    %9 = vector.broadcast %cst_7 : f32 to vector<24x128xf32>
    %10 = arith.maximumf %8, %9 : vector<24x128xf32>
    %11 = arith.subf %2, %4 : vector<24x128xf32>
    %cst_8 = arith.constant 9.99999974E-6 : f32
    %12 = vector.broadcast %cst_8 : f32 to vector<24x128xf32>
    %13 = arith.addf %10, %12 : vector<24x128xf32>
    %14 = math.rsqrt %13 : vector<24x128xf32>
    %15 = arith.mulf %11, %14 : vector<24x128xf32>
    %c0_9 = arith.constant 0 : index
    %c0_10 = arith.constant 0 : index
    %16 = vector.load %arg4[%c0_9, %c0_10] : memref<1x128xf32, #tpu.memory_space<vmem>>, vector<1x128xf32>
    %17 = vector.broadcast %16 : vector<1x128xf32> to vector<24x128xf32>
    %18 = arith.mulf %15, %17 : vector<24x128xf32>
    %c0_11 = arith.constant 0 : index
    %c0_12 = arith.constant 0 : index
    %19 = vector.load %arg5[%c0_11, %c0_12] : memref<1x128xf32, #tpu.memory_space<vmem>>, vector<1x128xf32>
    %20 = vector.broadcast %19 : vector<1x128xf32> to vector<24x128xf32>
    %21 = arith.addf %18, %20 : vector<24x128xf32>
    %c0_13 = arith.constant 0 : index
    %c0_14 = arith.constant 0 : index
    %22 = vector.load %arg6[%c0_13, %c0_14] : memref<24x128xf32, #tpu.memory_space<vmem>>, vector<24x128xf32>
    tpu.vector_store %arg6[%c0_13, %c0_14], %21 {strides = array<i32>} : memref<24x128xf32, #tpu.memory_space<vmem>>, vector<24x128xf32>,
    return
  }
  func.func @transform_0(%arg0: i32) -> (i32, i32) {
    %c0_i32 = arith.constant 0 : i32
    %c0_i32_0 = arith.constant 0 : i32
    return %arg0, %c0_i32 : i32, i32
  }
  func.func @transform_1(%arg0: i32) -> (i32, i32) {
    %c0_i32 = arith.constant 0 : i32
    %c0_i32_0 = arith.constant 0 : i32
    %c0_i32_1 = arith.constant 0 : i32
    return %c0_i32, %c0_i32_0 : i32, i32
  }
  func.func @transform_2(%arg0: i32) -> (i32, i32) {
    %c0_i32 = arith.constant 0 : i32
    %c0_i32_0 = arith.constant 0 : i32
    %c0_i32_1 = arith.constant 0 : i32
    return %c0_i32, %c0_i32_0 : i32, i32
  }
  func.func @transform_3(%arg0: i32) -> (i32, i32) {
    %c0_i32 = arith.constant 0 : i32
    %c0_i32_0 = arith.constant 0 : i32
    %c0_i32_1 = arith.constant 0 : i32
    return %c0_i32, %c0_i32_0 : i32, i32
  }
  func.func @transform_4(%arg0: i32) -> (i32, i32) {
    %c0_i32 = arith.constant 0 : i32
    %c0_i32_0 = arith.constant 0 : i32
    %c0_i32_1 = arith.constant 0 : i32
    return %c0_i32, %c0_i32_0 : i32, i32
  }
  func.func @transform_5(%arg0: i32) -> (i32, i32) {
    %c0_i32 = arith.constant 0 : i32
    %c0_i32_0 = arith.constant 0 : i32
    return %arg0, %c0_i32 : i32, i32
  }
}

</mosaic_0001>

<bundles_post_ra>
// kernel: tpu_custom_call.1
= control target key start
LH: loop header
LB: loop body
LE: loop exit
PB: predicated region body
PF: predicated region fallthrough
CT: control target
= control target key end

     0   :  { %vm40_vm0 = vcmask 261120   ;;  %v734_v2 = vmov 0.0|0.0   ;;  %vm735_vm2 = vmmov 0   ;;  %v736_v5 = vmov 0.0   ;;  %s1002_s0 = inlined_call_operand.vmem [shape: f32[24,32], index: 0, kind: input, shape index: {}]   ;;  %s1003_s1 = inlined_call_operand.vmem [shape: f32[128,32], index: 1, kind: input, shape index: {}]   ;;  %s1004_s2 = inlined_call_operand.vmem [shape: f32[128,128], index: 2, kind: input, shape index: {}]   ;;  %s1005_s3 = inlined_call_operand.vmem [shape: f32[1,128], index: 3, kind: input, shape index: {}]   ;;  %s1006_s4 = inlined_call_operand.vmem [shape: f32[1,128], index: 4, kind: input, shape index: {}]   ;;  %s1007_s5 = inlined_call_operand.hbm [shape: f32[24,128], index: 5, kind: output, shape index: {}]  }
   0x1   :  { %v24_v0 = vld [vmem:[%s1003_s1] sm:$0xff]  ;;  %v25_v1 = vld [vmem:[%s1003_s1 + $0x8] sm:$0xff]  ;;  %618 = vmatprep.subr.bf16.mxu0 %v734_v2  ;;  %vm779_vm1 = vmpackc.low %vm40_vm0, %vm40_vm0  ;;  %650 = vmatprep.subr.bf16.mxu1 %v734_v2 }
   0x2   :  { %v619_v3 = vpack.c.bf16 %v25_v1, %v24_v0  ;;  %527 = vmatprep.mubr.msk.f32.mxu0 %vm735_vm2, %v736_v5  ;;  %568 = vmatprep.mubr.msk.f32.mxu1 %vm735_vm2, %v736_v5  ;;  %v26_v6 = vld [vmem:[%s1003_s1 + $0x10] sm:$0xff]  ;;  %v27_v7 = vld [vmem:[%s1003_s1 + $0x18] sm:$0xff]  ;;  %v178_v8 = vld [vmem:[%s1004_s2] sm:$0xff] }
   0x3   :  { %v623_v9 = vpack.c.bf16 %v27_v7, %v26_v6  ;;  %v179_v10 = vld [vmem:[%s1004_s2 + $0x8] sm:$0xff]  ;;  %v180_v11 = vld [vmem:[%s1004_s2 + $0x10] sm:$0xff]  ;;  %v181_v12 = vld [vmem:[%s1004_s2 + $0x18] sm:$0xff] }
   0x4   :  { %621 = vmatpush3.bf16.xpose.msk.msra.mxu0 %vm779_vm1, %v619_v3  ;;  %v809_v13 = vpack.c.bf16 %v179_v10, %v178_v8  ;;  %v812_v14 = vpack.c.bf16 %v181_v12, %v180_v11  ;;  %v182_v15 = vld [vmem:[%s1004_s2 + $0x20] sm:$0xff]  ;;  %v183_v16 = vld [vmem:[%s1004_s2 + $0x28] sm:$0xff] }
   0x5   :  { %622 = vmatprep.subr.bf16.mxu0 %v734_v2  ;;  %v28_v17 = vld [vmem:[%s1003_s1 + $0x20] sm:$0xff]  ;;  %v29_v18 = vld [vmem:[%s1003_s1 + $0x28] sm:$0xff] }
   0x6   :  { %652 = vmatpush3.bf16.msra.mxu1 %v809_v13 }
   0x7   :  { %653 = vmatprep.subr.bf16.mxu1 %v734_v2 }
   0xc   :  { %625 = vmatpush3.bf16.xpose.msk.msra.mxu0 %vm779_vm1, %v623_v9 }
   0xd   :  { %626 = vmatprep.subr.bf16.mxu0 %v734_v2 }
   0xe   :  { %10 = vsyncpa [#allocation3], 0  ;;  %655 = vmatpush3.bf16.msra.mxu1 %v812_v14  ;;  %v831_v19 = vpack.c.bf16 %v183_v16, %v182_v15  ;;  %v627_v20 = vpack.c.bf16 %v29_v18, %v28_v17  ;;  %v184_v21 = vld [vmem:[%s1004_s2 + $0x30] sm:$0xff]  ;;  %v185_v22 = vld [vmem:[%s1004_s2 + $0x38] sm:$0xff]  ;;  %s737_s14 = smov [#allocation2]  }
   0xf   :  { %656 = vmatprep.subr.bf16.mxu1 %v734_v2  ;;  %v841_v23 = vpack.c.bf16 %v185_v22, %v184_v21  ;;  %v186_v24 = vld [vmem:[%s1004_s2 + $0x40] sm:$0xff]  ;;  %v187_v25 = vld [vmem:[%s1004_s2 + $0x48] sm:$0xff]  ;;  %v30_v26 = vld [vmem:[%s1003_s1 + $0x30] sm:$0xff]  ;;  %s406_s15 = sshll.u32 %s737_s14, 4  ;;  %s407_s15 = int_to_ptr.vmem [resolvable:$true] %s406_s15 }
  0x10   :  { %v31_v27 = vld [vmem:[%s1003_s1 + $0x38] sm:$0xff]  ;;  %v860_v28 = vpack.c.bf16 %v187_v25, %v186_v24  ;;  %v188_v30 = vld [vmem:[%s1004_s2 + $0x50] sm:$0xff]  ;;  %v190_v33 = vld [vmem:[%s1004_s2 + $0x60] sm:$0xff]  ;;  %p715_p1 = scmp.lt.s32.totalorder %s407_s15, %s407_s15 }
  0x11   :  { %v631_v29 = vpack.c.bf16 %v31_v27, %v30_v26  ;;  %v189_v31 = vld [vmem:[%s1004_s2 + $0x58] sm:$0xff]  ;;  %v191_v34 = vld [vmem:[%s1004_s2 + $0x68] sm:$0xff]  ;;  %v32_v35 = vld [vmem:[%s1003_s1 + $0x40] sm:$0xff] }
  0x12   :  { %658 = vmatpush3.bf16.msra.mxu1 %v831_v19  ;;  %v870_v32 = vpack.c.bf16 %v189_v31, %v188_v30  ;;  %v33_v36 = vld [vmem:[%s1003_s1 + $0x48] sm:$0xff]  ;;  %v669_v37 = vpack.c.bf16 %v191_v34, %v190_v33  ;;  %v192_v39 = vld [vmem:[%s1004_s2 + $0x70] sm:$0xff]  ;;  %v193_v40 = vld [vmem:[%s1004_s2 + $0x78] sm:$0xff] }
  0x13   :  { %659 = vmatprep.subr.bf16.mxu1 %v734_v2  ;;  %v635_v38 = vpack.c.bf16 %v33_v36, %v32_v35  ;;  %v672_v41 = vpack.c.bf16 %v193_v40, %v192_v39  ;;  %v34_v42 = vld [vmem:[%s1003_s1 + $0x50] sm:$0xff]  ;;  %v35_v43 = vld [vmem:[%s1003_s1 + $0x58] sm:$0xff]  ;;  %v36_v45 = vld [vmem:[%s1003_s1 + $0x60] sm:$0xff] }
  0x14   :  { %629 = vmatpush3.bf16.xpose.msk.msra.mxu0 %vm779_vm1, %v627_v20  ;;  %v639_v44 = vpack.c.bf16 %v35_v43, %v34_v42  ;;  %v37_v46 = vld [vmem:[%s1003_s1 + $0x68] sm:$0xff]  ;;  %v38_v48 = vld [vmem:[%s1003_s1 + $0x70] sm:$0xff]  ;;  %v39_v49 = vld [vmem:[%s1003_s1 + $0x78] sm:$0xff] }
  0x15   :  { %630 = vmatprep.subr.bf16.mxu0 %v734_v2  ;;  %v643_v47 = vpack.c.bf16 %v37_v46, %v36_v45  ;;  %v647_v50 = vpack.c.bf16 %v39_v49, %v38_v48  ;;  %v21_v51 = vld [vmem:[%s1002_s0] sm:$0xff]  ;;  %v22_v52 = vld [vmem:[%s1002_s0 + $0x8] sm:$0xff]  ;;  %v23_v53 = vld [vmem:[%s1002_s0 + $0x10] sm:$0xff] }
  0x16   :  { %661 = vmatpush3.bf16.msra.mxu1 %v841_v23  ;;  %v436_v27 = vld [vmem:[%s1005_s3] ss:$0 sm:$0xff]  ;;  %s710_s3 = scalar_lea.vmem %s407_s15, 384 }
  0x17   :  { %662 = vmatprep.subr.bf16.mxu1 %v734_v2  ;;  %p711_p0 = scmp.ne.s32.totalorder %s407_s15, %s710_s3  ;;  %p716_p2 = scmp.lt.s32.totalorder %s710_s3, %s710_s3 }
  0x19   :  { %p717_p3 = por %p716_p2, %p715_p1 }
  0x1a   :  { %664 = vmatpush3.bf16.msra.mxu1 %v860_v28 }
  0x1b   :  { %665 = vmatprep.subr.bf16.mxu1 %v734_v2  ;;  %p718_p4 = pnand %p717_p3, %p711_p0 }
  0x1c   :  { %633 = vmatpush3.bf16.xpose.msk.msra.mxu0 %vm779_vm1, %v631_v29  ;;  %v437_v29 = vld [vmem:[%s1006_s4] ss:$0 sm:$0xff] }
  0x1d   :  { %634 = vmatprep.subr.bf16.mxu0 %v734_v2 }
  0x1e   :  { %667 = vmatpush3.bf16.msra.mxu1 %v870_v32 }
  0x1f   :  { %668 = vmatprep.subr.bf16.mxu1 %v734_v2 }
  0x22   :  { %670 = vmatpush3.bf16.msra.mxu1 %v669_v37 }
  0x23   :  { %671 = vmatprep.subr.bf16.mxu1 %v734_v2 }
  0x24   :  { %637 = vmatpush3.bf16.xpose.msk.msra.mxu0 %vm779_vm1, %v635_v38 }
  0x25   :  { %638 = vmatprep.subr.bf16.mxu0 %v734_v2 }
  0x26   :  { %673 = vmatpush3.bf16.msra.mxu1 %v672_v41 }
  0x27   :  { %674 = vmatprep.subr.bf16.mxu1 %v734_v2 }
  0x2c   :  { %641 = vmatpush3.bf16.xpose.msk.msra.mxu0 %vm779_vm1, %v639_v44 }
  0x2d   :  { %642 = vmatprep.subr.bf16.mxu0 %v734_v2 }
  0x34   :  { %645 = vmatpush3.bf16.xpose.msk.msra.mxu0 %vm779_vm1, %v643_v47 }
  0x35   :  { %646 = vmatprep.subr.bf16.mxu0 %v734_v2 }
  0x3c   :  { %649 = vmatpush3.bf16.xpose.msk.msra.mxu0 %vm779_vm1, %v647_v50 }
  0x43   :  { %528 = vmatmul.mubr.msk.f32.vlgmr.msra.gmra.mrb[0].mxu0 %vm40_vm0, %v21_v51 }
  0x44   :  { %530 = vmatprep.mubr.msk.f32.mxu0 %vm735_vm2, %v736_v5 }
  0x47   :  { %531 = vmatmul.mubr.msk.f32.gmra.mrb[2].mxu0 %vm40_vm0, %v22_v52 }
  0x48   :  { %533 = vmatprep.mubr.msk.f32.mxu0 %vm735_vm2, %v736_v5 }
  0x4b   :  { %534 = vmatmul.mubr.msk.f32.gmra.mrb[4].mxu0 %vm40_vm0, %v23_v53 }
 0x116   :  { %v943_v54 = vpop.f32.mrb[0].mxu0 }
 0x117   :  { %v529_v55 = vpop.f32.mrb[1].mxu0  ;;  %569 = vmatmul.mubr.f32.vlgmr.msra.gmra.mrb[0].mxu1 %v943_v54  ;;  %v274_v60 = vmul.f32 %v943_v54, %v943_v54 }
 0x118   :  { %676 = vmatpush3.bf16.msra.mxu1 %v809_v13  ;;  %571 = vmatprep.mubr.msk.f32.mxu1 %vm735_vm2, %v736_v5 }
 0x119   :  { %677 = vmatprep.subr.bf16.mxu1 %v734_v2 }
 0x11a   :  { %v950_v56 = vpop.f32.mrb[2].mxu0 }
 0x11b   :  { %572 = vmatmul.mubr.f32.gmra.mrb[2].mxu1 %v950_v56  ;;  %v532_v57 = vpop.f32.mrb[3].mxu0  ;;  %v275_v61 = vmul.f32 %v950_v56, %v950_v56 }
 0x11c   :  { %679 = vmatpush3.bf16.msra.mxu1 %v812_v14  ;;  %574 = vmatprep.mubr.msk.f32.mxu1 %vm735_vm2, %v736_v5 }
 0x11d   :  { %680 = vmatprep.subr.bf16.mxu1 %v734_v2 }
 0x11e   :  { %v957_v58 = vpop.f32.mrb[4].mxu0 }
 0x11f   :  { %575 = vmatmul.mubr.f32.gmra.mrb[4].mxu1 %v957_v58  ;;  %v535_v59 = vpop.f32.mrb[5].mxu0  ;;  %v276_v62 = vmul.f32 %v957_v58, %v957_v58 }
 0x120   :  { %682 = vmatpush3.bf16.msra.mxu1 %v831_v19  ;;  %609 = vmatprep.mubr.msk.f32.mxu1 %vm735_vm2, %v736_v5 }
 0x121   :  { %683 = vmatprep.subr.bf16.mxu1 %v734_v2 }
 0x124   :  { %685 = vmatpush3.bf16.msra.mxu1 %v841_v23 }
 0x125   :  { %686 = vmatprep.subr.bf16.mxu1 %v734_v2 }
 0x128   :  { %688 = vmatpush3.bf16.msra.mxu1 %v860_v28 }
 0x129   :  { %689 = vmatprep.subr.bf16.mxu1 %v734_v2 }
 0x12c   :  { %691 = vmatpush3.bf16.msra.mxu1 %v870_v32 }
 0x12d   :  { %692 = vmatprep.subr.bf16.mxu1 %v734_v2 }
 0x130   :  { %694 = vmatpush3.bf16.msra.mxu1 %v669_v37 }
 0x131   :  { %695 = vmatprep.subr.bf16.mxu1 %v734_v2 }
 0x134   :  { %697 = vmatpush3.bf16.msra.mxu1 %v672_v41 }
 0x137   :  { %610 = vmatmul.mubr.f32.vlgmr.msra.gmra.mrb[6].mxu1 %v274_v60 }
 0x138   :  { %612 = vmatprep.mubr.msk.f32.mxu1 %vm735_vm2, %v736_v5 }
 0x13b   :  { %613 = vmatmul.mubr.f32.gmra.mrb[8].mxu1 %v275_v61 }
 0x13c   :  { %615 = vmatprep.mubr.msk.f32.mxu1 %vm735_vm2, %v736_v5 }
 0x13f   :  { %616 = vmatmul.mubr.f32.gmra.mrb[10].mxu1 %v276_v62 }
 0x1ea   :  { %v260_v63 = vpop.f32.mrb[0].mxu1 }
 0x1eb   :  { %v366_v0 = vsub.f32 %v943_v54, %v260_v63  ;;  %v570_v1 = vpop.f32.mrb[1].mxu1  ;;  %v357_v9 = vmul.f32 %v260_v63, %v260_v63 }
 0x1ee   :  { %v265_v2 = vpop.f32.mrb[2].mxu1 }
 0x1ef   :  { %v367_v3 = vsub.f32 %v950_v56, %v265_v2  ;;  %v573_v4 = vpop.f32.mrb[3].mxu1  ;;  %v358_v12 = vmul.f32 %v265_v2, %v265_v2 }
 0x1f2   :  { %v270_v6 = vpop.f32.mrb[4].mxu1 }
 0x1f3   :  { %v368_v7 = vsub.f32 %v957_v58, %v270_v6  ;;  %v576_v8 = vpop.f32.mrb[5].mxu1  ;;  %v359_v18 = vmul.f32 %v270_v6, %v270_v6 }
 0x20a   :  { %v343_v10 = vpop.f32.mrb[6].mxu1 }
 0x20b   :  { %v360_v11 = vsub.f32 %v343_v10, %v357_v9  ;;  %v611_v5 = vpop.f32.mrb[7].mxu1 }
 0x20d   :  { %v363_v13 = vmax.f32 %v360_v11, 0.0 }
 0x20e   :  { %v348_v14 = vpop.f32.mrb[8].mxu1 }
 0x20f   :  { %v369_v15 = vadd.f32 1e-05, %v363_v13  ;;  %v361_v16 = vsub.f32 %v348_v14, %v358_v12  ;;  %v614_v17 = vpop.f32.mrb[9].mxu1 }
 0x211   :  { %704 = vrsqrt.f32 %v369_v15  ;;  %v364_v19 = vmax.f32 %v361_v16, 0.0 }
 0x212   :  { %v353_v20 = vpop.f32.mrb[10].mxu1 }
 0x213   :  { %v370_v21 = vadd.f32 1e-05, %v364_v19  ;;  %v362_v22 = vsub.f32 %v353_v20, %v359_v18  ;;  %v617_v23 = vpop.f32.mrb[11].mxu1 }
 0x215   :  { %706 = vrsqrt.f32 %v370_v21  ;;  %v365_v24 = vmax.f32 %v362_v22, 0.0 }
 0x217   :  { %v371_v25 = vadd.f32 1e-05, %v365_v24 }
 0x219   :  { %708 = vrsqrt.f32 %v371_v25 }
 0x21b   :  { %v705_v26 = vpop.eup %704 }
 0x21c   :  { %v375_v28 = vmul.f32 %v705_v26, %v366_v0 }
 0x21e   :  { %v385_v30 = vmul.f32 %v436_v27, %v375_v28 }
 0x21f   :  { %v707_v31 = vpop.eup %706 }
 0x220   :  { %v376_v32 = vmul.f32 %v707_v31, %v367_v3  ;;  %v395_v33 = vadd.f32 %v437_v29, %v385_v30 }
 0x222   :  { %v386_v34 = vmul.f32 %v436_v27, %v376_v32  ;;  %398 = vst [vmem:[#allocation2] sm:$0xff] %v395_v33 }
 0x223   :  { %v709_v35 = vpop.eup %708 }
 0x224   :  { %v377_v36 = vmul.f32 %v709_v35, %v368_v7  ;;  %v396_v37 = vadd.f32 %v437_v29, %v386_v34 }
 0x226   :  { %v387_v38 = vmul.f32 %v436_v27, %v377_v36  ;;  %399 = vst [vmem:[#allocation2 + $0x8] sm:$0xff] %v396_v37 }
 0x228   :  { %v397_v39 = vadd.f32 %v437_v29, %v387_v38 }
 0x22a   :  { %400 = vst [vmem:[#allocation2 + $0x10] sm:$0xff] %v397_v39 }
 0x22b   :  { %721 = shalt.err (!%p718_p4)
}
 0x22c   :  { %s722_s17 = scalar_lea.hbm %s1007_s5, 384 }
 0x22d   :  { %p723_p5 = scmp.ne.s32.totalorder %s1007_s5, %s722_s17  ;;  %p726_p6 = scmp.lt.u32.totalorder %s722_s17, %s1007_s5 }
 0x22f   :  { %p728_p7 = pnand %p726_p6, %p723_p5 }
 0x231   :  { %731 = shalt.err (!%p728_p7)
}
 0x232   :  { %s738_s22 = smov 128   ;;  %s739_s23 = smov 8  }
 0x233   :  { %412 = dma.vmem_to_hbm [thread:$0]  %s407_s15, 384, %s1007_s5, [#allocation3], %s738_s22, %s738_s22, %s739_s23  }
 0x234   :  { %732 = dma.done.wait [#allocation3], 384  }
 0x235   :  { %733 = vsyncadd [#allocation3], 4294966912 }
 0x236   :  { %416 = vsyncpa [#allocation3], 1 }

</bundles_post_ra>
